<compile_context>
chip_gen: v7x
topology: tpu7x:2x2x1
jax: 0.10.0
libtpu: 0.0.40
codegen_flags: <defaults>
</compile_context>

<pallas_src>
import math
import jax
import jax.numpy as jnp
from jax.experimental import pallas as pl
from jax.experimental.pallas import tpu as pltpu

CLAMP_MIN = 0.00381269
CLAMP_MAX = 3.0708757648026784e-06   # < CLAMP_MIN, matching the PyTorch module

SUBLANE = 8                       # f32 sublanes per vreg
MAX_BLOCK_BYTES = 2 * 1024 * 1024 # 2 MiB/block; double-buffered in+out ~8 MiB


def _scale_clamp_kernel(w_ref, x_ref, o_ref):
    # Linear(1 -> 1, bias=False) == scalar broadcast-multiply (VPU, not MXU).
    w = w_ref[0]                              # scalar read from SMEM
    v1 = x_ref[...] * w                       # v1 = x @ W.T
    v2 = jnp.maximum(v1, CLAMP_MIN)           # clamp_min
    o_ref[...] = jnp.minimum(v2, CLAMP_MAX)   # clamp_max


def _round_up(a, b):
    return ((a + b - 1) // b) * b


def _linear_clamp_impl(x, w):
    """x: (B, 1) f32, w: (1, 1) f32  ->  (B, 1) f32."""
    B, _ = x.shape
    Fout = w.shape[0]

    # Lane width: wider last dim => fewer/wider unmasked vld/vst, but coarser
    # padding granularity. Pick based on (static) batch size.
    if B >= SUBLANE * 1024:
        width = 1024
    elif B >= SUBLANE * 512:
        width = 512
    elif B >= SUBLANE * 256:
        width = 256
    else:
        width = 128

    pad_granule = SUBLANE * width            # minimal (8, width) layout granule
    Bp = _round_up(B, pad_granule)
    n_rows = Bp // width

    # ~2 MiB block cap (safe under v5e's 16 MiB scoped-VMEM default with
    # double-buffered input + output), aligned to the sublane granule.
    max_row_tile = max(SUBLANE,
                       (MAX_BLOCK_BYTES // (4 * width)) // SUBLANE * SUBLANE)
    # Ensure >= 2 grid steps whenever possible so v7x's 2 TCs both get work.
    row_tile = min(max_row_tile, _round_up(pl.cdiv(n_rows, 2), SUBLANE))
    row_tile = min(row_tile, n_rows)
    num_blocks = pl.cdiv(n_rows, row_tile)   # ragged tail handled by Pallas

    # Reshapes of contiguous data are free; only pad/slice cost HBM passes,
    # and they are skipped when B is already aligned (static check).
    x_flat = x.reshape(-1)
    if Bp != B:
        x_flat = jnp.pad(x_flat, (0, Bp - B))
    x2d = x_flat.reshape(n_rows, width)
    w_flat = w.reshape(-1)                   # (1,) f32, delivered via SMEM

    out2d = pl.pallas_call(
        _scale_clamp_kernel,
        out_shape=jax.ShapeDtypeStruct((n_rows, width), x.dtype),
        grid_spec=pltpu.PrefetchScalarGridSpec(
            num_scalar_prefetch=0,
            grid=(num_blocks,),
            in_specs=[
                # 1x1 weight: whole array in SMEM, read as a scalar.
                pl.BlockSpec(memory_space=pltpu.MemorySpace.SMEM),
                # lane-dense input blocks
                pl.BlockSpec((row_tile, width), lambda i: (i, 0)),
            ],
            out_specs=pl.BlockSpec((row_tile, width), lambda i: (i, 0)),
        ),
        compiler_params=pltpu.CompilerParams(
            dimension_semantics=("parallel",),   # independent blocks -> both TCs
        ),
        cost_estimate=pl.CostEstimate(
            flops=Bp, transcendentals=0, bytes_accessed=2 * Bp * 4 + 4),
    )(w_flat, x2d)

    out_flat = out2d.reshape(-1)
    if Bp != B:
        out_flat = out_flat[:B]
    return out_flat.reshape(B, Fout)


linear_clamp = jax.jit(_linear_clamp_impl)


if __name__ == "__main__":
    key = jax.random.PRNGKey(0)
    kx, kw, kx2 = jax.random.split(key, 3)

    Fin, Fout = 1, 1
    # kaiming_uniform_(a=sqrt(5)) on a (1,1) weight -> Uniform(-1, 1)
    bound = math.sqrt(6.0 / ((1.0 + 5.0) * Fin))  # = 1.0
    w = jax.random.uniform(kw, (Fout, Fin), dtype=jnp.float32,
                           minval=-bound, maxval=bound)

    def ref_fn(x):
        return jnp.minimum(jnp.maximum(x @ w.T, CLAMP_MIN), CLAMP_MAX)

    # Exact shape implied by the module's forward: x1 = torch.randn(1, 1)
    x_small = jax.random.normal(kx, (1, Fin), dtype=jnp.float32)
    out_small = linear_clamp(x_small, w)
    jax.block_until_ready(out_small)
    assert out_small.shape == (1, Fout)
    assert jnp.allclose(out_small, ref_fn(x_small), atol=1e-6)

    # A second, aligned batch exercising the pad-free path and a multi-step grid.
    B2 = 2048
    x_big = jax.random.normal(kx2, (B2, Fin), dtype=jnp.float32)
    out_big = linear_clamp(x_big, w)
    jax.block_until_ready(out_big)
    assert out_big.shape == (B2, Fout)
    assert jnp.allclose(out_big, ref_fn(x_big), atol=1e-6)

    print("KERNEL_OK")
</pallas_src>

<mosaic_0001>
module attributes {stable_mosaic.version = 11 : i64} {
  func.func @_scale_clamp_kernel(%arg0: i32, %arg1: memref<1xf32, #tpu.memory_space<smem>>, %arg2: memref<8x128xf32, #tpu.memory_space<vmem>>, %arg3: memref<8x128xf32, #tpu.memory_space<vmem>>) attributes {dimension_semantics = [#tpu.dimension_semantics<parallel>], iteration_bounds = array<i64: 1>, scalar_prefetch = 0 : i64, scratch_operands = 0 : i64, tpu.core_type = #tpu.core_type<tc>, window_params = [{transform_indices = @transform_0, window_bounds = array<i64: 1>}, {transform_indices = @transform_1, window_bounds = array<i64: 8, 128>}, {transform_indices = @transform_2, window_bounds = array<i64: 8, 128>}]} {
    %c0 = arith.constant 0 : index
    %0 = memref.load %arg1[%c0] : memref<1xf32, #tpu.memory_space<smem>>
    %c0_0 = arith.constant 0 : index
    %c0_1 = arith.constant 0 : index
    %1 = vector.load %arg2[%c0_0, %c0_1] : memref<8x128xf32, #tpu.memory_space<vmem>>, vector<8x128xf32>
    %2 = vector.broadcast %0 : f32 to vector<8x128xf32>
    %3 = arith.mulf %1, %2 : vector<8x128xf32>
    %cst = arith.constant 3.812690e-03 : f32
    %4 = vector.broadcast %cst : f32 to vector<8x128xf32>
    %5 = arith.maximumf %3, %4 : vector<8x128xf32>
    %cst_2 = arith.constant 3.07087566E-6 : f32
    %6 = vector.broadcast %cst_2 : f32 to vector<8x128xf32>
    %7 = arith.minimumf %5, %6 : vector<8x128xf32>
    %c0_3 = arith.constant 0 : index
    %c0_4 = arith.constant 0 : index
    %8 = vector.load %arg3[%c0_3, %c0_4] : memref<8x128xf32, #tpu.memory_space<vmem>>, vector<8x128xf32>
    tpu.vector_store %arg3[%c0_3, %c0_4], %7 {strides = array<i32>} : memref<8x128xf32, #tpu.memory_space<vmem>>, vector<8x128xf32>,
    return
  }
  func.func @transform_0(%arg0: i32) -> i32 {
    %c0_i32 = arith.constant 0 : i32
    %c0_i32_0 = arith.constant 0 : i32
    return %c0_i32 : i32
  }
  func.func @transform_1(%arg0: i32) -> (i32, i32) {
    %c0_i32 = arith.constant 0 : i32
    %c0_i32_0 = arith.constant 0 : i32
    return %arg0, %c0_i32 : i32, i32
  }
  func.func @transform_2(%arg0: i32) -> (i32, i32) {
    %c0_i32 = arith.constant 0 : i32
    %c0_i32_0 = arith.constant 0 : i32
    return %arg0, %c0_i32 : i32, i32
  }
}

</mosaic_0001>

<bundles_post_ra>
// kernel: _linear_clamp_impl.1
= control target key start
LH: loop header
LB: loop body
LE: loop exit
PB: predicated region body
PF: predicated region fallthrough
CT: control target
= control target key end

     0   :  { %s47_s0 = inlined_call_operand.<no memory space> [shape: f32[1], index: 0, kind: input, shape index: {}]   ;;  %s48_s1 = inlined_call_operand.vmem [shape: f32[8,128], index: 1, kind: input, shape index: {}]   ;;  %s49_s2 = inlined_call_operand.vmem [shape: f32[8,128], index: 2, kind: output, shape index: {}]  }
   0x1   :  { %v13_v0 = vld [vmem:[%s48_s1] sm:$0xff]  ;;  %v14_v1 = vstv %s47_s0 }
   0x2   :  { %v15_v2 = vmul.f32 %v14_v1, %v13_v0 }
   0x4   :  { %v16_v3 = vmax.f32 %v15_v2, 0.00381269 }
   0x6   :  { %v17_v4 = vmin.f32 %v16_v3, 3.0708757e-06 }
   0x8   :  { %18 = vst [vmem:[%s49_s2] sm:$0xff] %v17_v4 }

</bundles_post_ra>
